<compile_context>
chip_gen: v6e
topology: v6e:2x2x1
jax: 0.10.0
libtpu: 0.0.40
codegen_flags: <defaults>
</compile_context>

<pallas_src>
import functools

import jax
import jax.numpy as jnp
from jax import lax
from jax.experimental import pallas as pl
from jax.experimental.pallas import tpu as pltpu


# --------------------------------------------------------------------------- #
# Pass 1: conv (as KH lane-dense matmuls) + bias + LeakyReLU + partial BN stats
# --------------------------------------------------------------------------- #
def _conv_lrelu_stats_kernel(xp_ref, t_ref, b_ref, y_ref, s_ref, *,
                             dilation, negative_slope):
    # xp_ref : (Hp, Wp*Cin)      whole padded image of batch element n (f32)
    # t_ref  : (KH, Wp*Cin, WC)  per-kh row-Toeplitz weights, WC = Wo*Cout
    # b_ref  : (1, WC)           conv bias broadcast over w (lane-dense)
    # y_ref  : (TH, WC)          output tile: post conv+bias+LeakyReLU, pre-BN
    # s_ref  : (2, WC)           per-tile partial [sum; sum of squares]
    KH, _, WC = t_ref.shape
    TH = y_ref.shape[0]

    h0 = pl.multiple_of(pl.program_id(1) * TH, TH)   # first output row of tile

    acc = jnp.zeros((TH, WC), jnp.float32)
    for kh in range(KH):                             # static unroll over KH taps
        rows = xp_ref[pl.ds(h0 + kh * dilation, TH), :]      # (TH, Wp*Cin)
        acc = acc + jnp.dot(rows, t_ref[kh],
                            preferred_element_type=jnp.float32)

    acc = acc + b_ref[...]                           # conv bias
    acc = jnp.maximum(acc, negative_slope * acc)     # LeakyReLU (0 < slope < 1)

    y_ref[...] = acc.astype(y_ref.dtype)
    # One-pass stats: per-lane (i.e. per (w, channel)) partial sums; the tiny
    # channel-wise reduction over (N, tiles, w) is finalized in the wrapper.
    s_ref[...] = jnp.concatenate(
        [jnp.sum(acc, axis=0, keepdims=True),
         jnp.sum(acc * acc, axis=0, keepdims=True)], axis=0)


# --------------------------------------------------------------------------- #
# Pass 2: BN normalize (lane-dense scale/shift)
# --------------------------------------------------------------------------- #
def _bn_apply_kernel(y_ref, sc_ref, sh_ref, o_ref):
    # y_ref/o_ref : (TH, WC);  sc_ref/sh_ref : (1, WC)
    o_ref[...] = (y_ref[...] * sc_ref[...] + sh_ref[...]).astype(o_ref.dtype)


# --------------------------------------------------------------------------- #
# Wrapper
# --------------------------------------------------------------------------- #
@functools.partial(jax.jit,
                   static_argnames=("padding", "dilation", "negative_slope", "eps"))
def conv2d_leakyrelu_bn(x_nchw, weight, bias, gamma, beta, *,
                        padding, dilation, negative_slope, eps=1e-5):
    """x_nchw: (N, Cin, H, W); weight: (Cout, Cin, KH, KW) (PyTorch OIHW)."""
    N, Cin, H, W = x_nchw.shape
    Cout, _, KH, KW = weight.shape
    Hp, Wp = H + 2 * padding, W + 2 * padding
    Ho = Hp - dilation * (KH - 1)
    Wo = Wp - dilation * (KW - 1)
    WpC = Wp * Cin            # input lane dim  (w-major, channel-minor)
    WC = Wo * Cout            # output lane dim (w-major, channel-minor)

    # Row tile (sublane dim of the output block). 8 keeps several parallel grid
    # steps for the demo; raise to a larger multiple of 8 for big images.
    TH = 8 if Ho % 8 == 0 else Ho
    n_th = Ho // TH

    # ---- layout glue (would disappear if the whole model were channels-last) ----
    x = jnp.transpose(x_nchw, (0, 2, 3, 1))                               # NHWC
    xp = jnp.pad(x, ((0, 0), (padding, padding), (padding, padding), (0, 0)))
    xp2 = xp.reshape(N, Hp, WpC).astype(jnp.float32)       # (N, Hp, Wp*Cin)

    # ---- fold KW taps + channel mix into per-kh row-Toeplitz weights ----------
    # T[kh, wp*Cin+ci, wo*Cout+co] = sum_kw W[kh,kw,ci,co] * [wp == wo + kw*dil]
    w = jnp.transpose(weight, (2, 3, 1, 0)).astype(jnp.float32)  # (KH,KW,Cin,Cout)
    wp_i = jnp.arange(Wp)[None, :, None]
    wo_i = jnp.arange(Wo)[None, None, :]
    kw_i = jnp.arange(KW)[:, None, None]
    P = (wp_i == wo_i + kw_i * dilation).astype(jnp.float32)     # (KW, Wp, Wo)
    T = jnp.einsum('kpq,hkio->hpiqo', P, w).reshape(KH, WpC, WC)

    b_row = jnp.tile(bias.astype(jnp.float32), Wo).reshape(1, WC)

    # ---- pass 1: conv + bias + LeakyReLU + partial BN stats -------------------
    kern1 = functools.partial(_conv_lrelu_stats_kernel,
                              dilation=dilation, negative_slope=negative_slope)
    y, stats = pl.pallas_call(
        kern1,
        grid=(N, n_th),
        in_specs=[
            pl.BlockSpec((None, Hp, WpC), lambda n, t: (n, 0, 0)),   # padded image
            pl.BlockSpec((KH, WpC, WC), lambda n, t: (0, 0, 0)),     # Toeplitz W
            pl.BlockSpec((1, WC), lambda n, t: (0, 0)),              # bias row
        ],
        out_specs=(
            pl.BlockSpec((None, TH, WC), lambda n, t: (n, t, 0)),    # y tiles
            pl.BlockSpec((None, 2, WC),
                         lambda n, t: (n * n_th + t, 0, 0)),         # partial stats
        ),
        out_shape=(
            jax.ShapeDtypeStruct((N, Ho, WC), jnp.float32),
            jax.ShapeDtypeStruct((N * n_th, 2, WC), jnp.float32),
        ),
        compiler_params=pltpu.CompilerParams(
            dimension_semantics=("parallel", "parallel")),
    )(xp2, T, b_row)

    # ---- finalize BN statistics (tiny: N*n_th*2*WC floats) --------------------
    M = N * Ho * Wo
    st = stats.reshape(N * n_th, 2, Wo, Cout)
    s1 = jnp.sum(st[:, 0], axis=(0, 1))                  # (Cout,)  sum(y)
    s2 = jnp.sum(st[:, 1], axis=(0, 1))                  # (Cout,)  sum(y^2)
    mean = s1 / M
    var = jnp.maximum(s2 / M - mean * mean, 0.0)         # biased (training-mode BN)
    inv = lax.rsqrt(var + eps)
    scale_c = gamma.astype(jnp.float32) * inv
    shift_c = beta.astype(jnp.float32) - mean * scale_c
    scale_row = jnp.tile(scale_c, Wo).reshape(1, WC)
    shift_row = jnp.tile(shift_c, Wo).reshape(1, WC)

    # ---- pass 2: normalize (lane-dense elementwise) ---------------------------
    out2 = pl.pallas_call(
        _bn_apply_kernel,
        grid=(N, n_th),
        in_specs=[
            pl.BlockSpec((None, TH, WC), lambda n, t: (n, t, 0)),
            pl.BlockSpec((1, WC), lambda n, t: (0, 0)),
            pl.BlockSpec((1, WC), lambda n, t: (0, 0)),
        ],
        out_specs=pl.BlockSpec((None, TH, WC), lambda n, t: (n, t, 0)),
        out_shape=jax.ShapeDtypeStruct((N, Ho, WC), x_nchw.dtype),
        compiler_params=pltpu.CompilerParams(
            dimension_semantics=("parallel", "parallel")),
    )(y, scale_row, shift_row)

    # back to PyTorch NCHW
    return jnp.transpose(out2.reshape(N, Ho, Wo, Cout), (0, 3, 1, 2))


# --------------------------------------------------------------------------- #
# Pure-JAX reference (correctness check only)
# --------------------------------------------------------------------------- #
def _reference(x, weight, bias, gamma, beta, *, padding, dilation,
               negative_slope, eps=1e-5):
    out = lax.conv_general_dilated(
        x, weight, window_strides=(1, 1),
        padding=[(padding, padding), (padding, padding)],
        rhs_dilation=(dilation, dilation),
        dimension_numbers=('NCHW', 'OIHW', 'NCHW'))
    out = out + bias[None, :, None, None]
    out = jnp.where(out >= 0, out, negative_slope * out)
    mean = out.mean(axis=(0, 2, 3), keepdims=True)
    var = ((out - mean) ** 2).mean(axis=(0, 2, 3), keepdims=True)   # biased
    out = (out - mean) * lax.rsqrt(var + eps)
    return out * gamma[None, :, None, None] + beta[None, :, None, None]


if __name__ == "__main__":
    # Conv2DLeakyReLUBN(input_channels=4, layer_width=8, kernel_size=3,
    #                   padding=1, dilation=1, negative_slope=0.1)
    input_channels = 4
    layer_width = 8
    kernel_size = 3
    padding = 1
    dilation = 1
    negative_slope = 0.1

    key = jax.random.PRNGKey(0)
    kx, kw, kb, kg, kbt = jax.random.split(key, 5)

    x = jax.random.normal(kx, (2, input_channels, 16, 16), dtype=jnp.float32)
    weight = 0.1 * jax.random.normal(
        kw, (layer_width, input_channels, kernel_size, kernel_size),
        dtype=jnp.float32)
    bias = 0.1 * jax.random.normal(kb, (layer_width,), dtype=jnp.float32)
    gamma = 1.0 + 0.1 * jax.random.normal(kg, (layer_width,), dtype=jnp.float32)
    beta = 0.1 * jax.random.normal(kbt, (layer_width,), dtype=jnp.float32)

    out = conv2d_leakyrelu_bn(x, weight, bias, gamma, beta,
                              padding=padding, dilation=dilation,
                              negative_slope=negative_slope)
    out = jax.block_until_ready(out)

    ref = _reference(x, weight, bias, gamma, beta,
                     padding=padding, dilation=dilation,
                     negative_slope=negative_slope)
    assert out.shape == (2, layer_width, 16, 16), out.shape
    assert jnp.allclose(out, ref, atol=2e-4, rtol=2e-4), \
        float(jnp.max(jnp.abs(out - ref)))

    print("KERNEL_OK")
</pallas_src>

<mosaic_0001>
module attributes {stable_mosaic.version = 11 : i64} {
  func.func @_conv_lrelu_stats_kernel(%arg0: i32, %arg1: i32, %arg2: memref<1x18x72xf32, #tpu.memory_space<vmem>>, %arg3: memref<3x72x128xf32, #tpu.memory_space<vmem>>, %arg4: memref<1x128xf32, #tpu.memory_space<vmem>>, %arg5: memref<1x8x128xf32, #tpu.memory_space<vmem>>, %arg6: memref<1x2x128xf32, #tpu.memory_space<vmem>>) attributes {dimension_semantics = [#tpu.dimension_semantics<parallel>, #tpu.dimension_semantics<parallel>], iteration_bounds = array<i64: 2, 2>, scalar_prefetch = 0 : i64, scratch_operands = 0 : i64, tpu.core_type = #tpu.core_type<tc>, window_params = [{transform_indices = @transform_0, window_bounds = array<i64: 1, 18, 72>}, {pipeline_mode = #tpu.pipeline_mode<synchronous>, transform_indices = @transform_1, window_bounds = array<i64: 3, 72, 128>}, {pipeline_mode = #tpu.pipeline_mode<synchronous>, transform_indices = @transform_2, window_bounds = array<i64: 1, 128>}, {transform_indices = @transform_3, window_bounds = array<i64: 1, 8, 128>}, {transform_indices = @transform_4, window_bounds = array<i64: 1, 2, 128>}]} {
    %c8_i32 = arith.constant 8 : i32
    %0 = arith.muli %arg1, %c8_i32 : i32
    %1 = tpu.assume_multiple %0, 8 : i32
    %cst = arith.constant 0.000000e+00 : f32
    %2 = vector.broadcast %cst : f32 to vector<8x128xf32>
    %c0_i32 = arith.constant 0 : i32
    %3 = arith.addi %1, %c0_i32 : i32
    %c0 = arith.constant 0 : index
    %4 = arith.index_cast %3 : i32 to index
    %c0_0 = arith.constant 0 : index
    %5 = vector.load %arg2[%c0, %4, %c0_0] : memref<1x18x72xf32, #tpu.memory_space<vmem>>, vector<1x8x72xf32>
    %6 = vector.shape_cast %5 : vector<1x8x72xf32> to vector<8x72xf32>
    %c0_1 = arith.constant 0 : index
    %c0_2 = arith.constant 0 : index
    %c0_3 = arith.constant 0 : index
    %7 = vector.load %arg3[%c0_1, %c0_2, %c0_3] : memref<3x72x128xf32, #tpu.memory_space<vmem>>, vector<1x72x128xf32>
    %8 = vector.shape_cast %7 : vector<1x72x128xf32> to vector<72x128xf32>
    %cst_4 = arith.constant dense<0.000000e+00> : vector<8x128xf32>
    %9 = tpu.matmul %6, %8, %cst_4 {dimension_numbers = #tpu.dot_dimension_numbers<[1], [0], [0], [1], [0, 0, 1, 1], [], []>} : vector<8x72xf32>, vector<72x128xf32>, vector<8x128xf32> -> vector<8x128xf32>
    %10 = arith.addf %2, %9 : vector<8x128xf32>
    %c1_i32 = arith.constant 1 : i32
    %11 = arith.addi %1, %c1_i32 : i32
    %c0_5 = arith.constant 0 : index
    %12 = arith.index_cast %11 : i32 to index
    %c0_6 = arith.constant 0 : index
    %13 = vector.load %arg2[%c0_5, %12, %c0_6] : memref<1x18x72xf32, #tpu.memory_space<vmem>>, vector<1x8x72xf32>
    %14 = vector.shape_cast %13 : vector<1x8x72xf32> to vector<8x72xf32>
    %c1 = arith.constant 1 : index
    %c0_7 = arith.constant 0 : index
    %c0_8 = arith.constant 0 : index
    %15 = vector.load %arg3[%c1, %c0_7, %c0_8] : memref<3x72x128xf32, #tpu.memory_space<vmem>>, vector<1x72x128xf32>
    %16 = vector.shape_cast %15 : vector<1x72x128xf32> to vector<72x128xf32>
    %cst_9 = arith.constant dense<0.000000e+00> : vector<8x128xf32>
    %17 = tpu.matmul %14, %16, %cst_9 {dimension_numbers = #tpu.dot_dimension_numbers<[1], [0], [0], [1], [0, 0, 1, 1], [], []>} : vector<8x72xf32>, vector<72x128xf32>, vector<8x128xf32> -> vector<8x128xf32>
    %18 = arith.addf %10, %17 : vector<8x128xf32>
    %c2_i32 = arith.constant 2 : i32
    %19 = arith.addi %1, %c2_i32 : i32
    %c0_10 = arith.constant 0 : index
    %20 = arith.index_cast %19 : i32 to index
    %c0_11 = arith.constant 0 : index
    %21 = vector.load %arg2[%c0_10, %20, %c0_11] : memref<1x18x72xf32, #tpu.memory_space<vmem>>, vector<1x8x72xf32>
    %22 = vector.shape_cast %21 : vector<1x8x72xf32> to vector<8x72xf32>
    %c2 = arith.constant 2 : index
    %c0_12 = arith.constant 0 : index
    %c0_13 = arith.constant 0 : index
    %23 = vector.load %arg3[%c2, %c0_12, %c0_13] : memref<3x72x128xf32, #tpu.memory_space<vmem>>, vector<1x72x128xf32>
    %24 = vector.shape_cast %23 : vector<1x72x128xf32> to vector<72x128xf32>
    %cst_14 = arith.constant dense<0.000000e+00> : vector<8x128xf32>
    %25 = tpu.matmul %22, %24, %cst_14 {dimension_numbers = #tpu.dot_dimension_numbers<[1], [0], [0], [1], [0, 0, 1, 1], [], []>} : vector<8x72xf32>, vector<72x128xf32>, vector<8x128xf32> -> vector<8x128xf32>
    %26 = arith.addf %18, %25 : vector<8x128xf32>
    %c0_15 = arith.constant 0 : index
    %c0_16 = arith.constant 0 : index
    %27 = vector.load %arg4[%c0_15, %c0_16] : memref<1x128xf32, #tpu.memory_space<vmem>>, vector<1x128xf32>
    %28 = vector.broadcast %27 : vector<1x128xf32> to vector<8x128xf32>
    %29 = arith.addf %26, %28 : vector<8x128xf32>
    %cst_17 = arith.constant 1.000000e-01 : f32
    %30 = vector.broadcast %cst_17 : f32 to vector<8x128xf32>
    %31 = arith.mulf %30, %29 : vector<8x128xf32>
    %32 = arith.maximumf %29, %31 : vector<8x128xf32>
    %c0_18 = arith.constant 0 : index
    %c0_19 = arith.constant 0 : index
    %c0_20 = arith.constant 0 : index
    %33 = vector.load %arg5[%c0_18, %c0_19, %c0_20] : memref<1x8x128xf32, #tpu.memory_space<vmem>>, vector<1x8x128xf32>
    %34 = vector.shape_cast %33 : vector<1x8x128xf32> to vector<8x128xf32>
    %35 = vector.shape_cast %32 : vector<8x128xf32> to vector<1x8x128xf32>
    tpu.vector_store %arg5[%c0_18, %c0_19, %c0_20], %35 {strides = array<i32>} : memref<1x8x128xf32, #tpu.memory_space<vmem>>, vector<1x8x128xf32>,
    %cst_21 = arith.constant dense<0.000000e+00> : vector<128xf32>
    %36 = vector.multi_reduction <add>, %32, %cst_21 [0] : vector<8x128xf32> to vector<128xf32>
    %37 = vector.shape_cast %36 : vector<128xf32> to vector<1x128xf32>
    %38 = arith.mulf %32, %32 : vector<8x128xf32>
    %cst_22 = arith.constant dense<0.000000e+00> : vector<128xf32>
    %39 = vector.multi_reduction <add>, %38, %cst_22 [0] : vector<8x128xf32> to vector<128xf32>
    %40 = vector.shape_cast %39 : vector<128xf32> to vector<1x128xf32>
    %41 = tpu.concatenate %37, %40 in 0 : vector<1x128xf32>, vector<1x128xf32> -> vector<2x128xf32>
    %c0_23 = arith.constant 0 : index
    %c0_24 = arith.constant 0 : index
    %c0_25 = arith.constant 0 : index
    %42 = vector.load %arg6[%c0_23, %c0_24, %c0_25] : memref<1x2x128xf32, #tpu.memory_space<vmem>>, vector<1x2x128xf32>
    %43 = vector.shape_cast %42 : vector<1x2x128xf32> to vector<2x128xf32>
    %44 = vector.shape_cast %41 : vector<2x128xf32> to vector<1x2x128xf32>
    tpu.vector_store %arg6[%c0_23, %c0_24, %c0_25], %44 {strides = array<i32>} : memref<1x2x128xf32, #tpu.memory_space<vmem>>, vector<1x2x128xf32>,
    return
  }
  func.func @transform_0(%arg0: i32, %arg1: i32) -> (i32, i32, i32) {
    %c0_i32 = arith.constant 0 : i32
    %c0_i32_0 = arith.constant 0 : i32
    %c0_i32_1 = arith.constant 0 : i32
    return %arg0, %c0_i32, %c0_i32_0 : i32, i32, i32
  }
  func.func @transform_1(%arg0: i32, %arg1: i32) -> (i32, i32, i32) {
    %c0_i32 = arith.constant 0 : i32
    %c0_i32_0 = arith.constant 0 : i32
    %c0_i32_1 = arith.constant 0 : i32
    %c0_i32_2 = arith.constant 0 : i32
    return %c0_i32, %c0_i32_0, %c0_i32_1 : i32, i32, i32
  }
  func.func @transform_2(%arg0: i32, %arg1: i32) -> (i32, i32) {
    %c0_i32 = arith.constant 0 : i32
    %c0_i32_0 = arith.constant 0 : i32
    %c0_i32_1 = arith.constant 0 : i32
    return %c0_i32, %c0_i32_0 : i32, i32
  }
  func.func @transform_3(%arg0: i32, %arg1: i32) -> (i32, i32, i32) {
    %c0_i32 = arith.constant 0 : i32
    %c0_i32_0 = arith.constant 0 : i32
    return %arg0, %arg1, %c0_i32 : i32, i32, i32
  }
  func.func @transform_4(%arg0: i32, %arg1: i32) -> (i32, i32, i32) {
    %c2_i32 = arith.constant 2 : i32
    %0 = arith.muli %arg0, %c2_i32 : i32
    %1 = arith.addi %0, %arg1 : i32
    %c0_i32 = arith.constant 0 : i32
    %c0_i32_0 = arith.constant 0 : i32
    %c0_i32_1 = arith.constant 0 : i32
    return %1, %c0_i32, %c0_i32_0 : i32, i32, i32
  }
}

module attributes {stable_mosaic.version = 11 : i64} {
  func.func @_bn_apply_kernel(%arg0: i32, %arg1: i32, %arg2: memref<1x8x128xf32, #tpu.memory_space<vmem>>, %arg3: memref<1x128xf32, #tpu.memory_space<vmem>>, %arg4: memref<1x128xf32, #tpu.memory_space<vmem>>, %arg5: memref<1x8x128xf32, #tpu.memory_space<vmem>>) attributes {dimension_semantics = [#tpu.dimension_semantics<parallel>, #tpu.dimension_semantics<parallel>], iteration_bounds = array<i64: 2, 2>, scalar_prefetch = 0 : i64, scratch_operands = 0 : i64, tpu.core_type = #tpu.core_type<tc>, window_params = [{transform_indices = @transform_0, window_bounds = array<i64: 1, 8, 128>}, {pipeline_mode = #tpu.pipeline_mode<synchronous>, transform_indices = @transform_1, window_bounds = array<i64: 1, 128>}, {pipeline_mode = #tpu.pipeline_mode<synchronous>, transform_indices = @transform_2, window_bounds = array<i64: 1, 128>}, {transform_indices = @transform_3, window_bounds = array<i64: 1, 8, 128>}]} {
    %c0 = arith.constant 0 : index
    %c0_0 = arith.constant 0 : index
    %c0_1 = arith.constant 0 : index
    %0 = vector.load %arg2[%c0, %c0_0, %c0_1] : memref<1x8x128xf32, #tpu.memory_space<vmem>>, vector<1x8x128xf32>
    %1 = vector.shape_cast %0 : vector<1x8x128xf32> to vector<8x128xf32>
    %c0_2 = arith.constant 0 : index
    %c0_3 = arith.constant 0 : index
    %2 = vector.load %arg3[%c0_2, %c0_3] : memref<1x128xf32, #tpu.memory_space<vmem>>, vector<1x128xf32>
    %3 = vector.broadcast %2 : vector<1x128xf32> to vector<8x128xf32>
    %4 = arith.mulf %1, %3 : vector<8x128xf32>
    %c0_4 = arith.constant 0 : index
    %c0_5 = arith.constant 0 : index
    %5 = vector.load %arg4[%c0_4, %c0_5] : memref<1x128xf32, #tpu.memory_space<vmem>>, vector<1x128xf32>
    %6 = vector.broadcast %5 : vector<1x128xf32> to vector<8x128xf32>
    %7 = arith.addf %4, %6 : vector<8x128xf32>
    %c0_6 = arith.constant 0 : index
    %c0_7 = arith.constant 0 : index
    %c0_8 = arith.constant 0 : index
    %8 = vector.load %arg5[%c0_6, %c0_7, %c0_8] : memref<1x8x128xf32, #tpu.memory_space<vmem>>, vector<1x8x128xf32>
    %9 = vector.shape_cast %8 : vector<1x8x128xf32> to vector<8x128xf32>
    %10 = vector.shape_cast %7 : vector<8x128xf32> to vector<1x8x128xf32>
    tpu.vector_store %arg5[%c0_6, %c0_7, %c0_8], %10 {strides = array<i32>} : memref<1x8x128xf32, #tpu.memory_space<vmem>>, vector<1x8x128xf32>,
    return
  }
  func.func @transform_0(%arg0: i32, %arg1: i32) -> (i32, i32, i32) {
    %c0_i32 = arith.constant 0 : i32
    %c0_i32_0 = arith.constant 0 : i32
    return %arg0, %arg1, %c0_i32 : i32, i32, i32
  }
  func.func @transform_1(%arg0: i32, %arg1: i32) -> (i32, i32) {
    %c0_i32 = arith.constant 0 : i32
    %c0_i32_0 = arith.constant 0 : i32
    %c0_i32_1 = arith.constant 0 : i32
    return %c0_i32, %c0_i32_0 : i32, i32
  }
  func.func @transform_2(%arg0: i32, %arg1: i32) -> (i32, i32) {
    %c0_i32 = arith.constant 0 : i32
    %c0_i32_0 = arith.constant 0 : i32
    %c0_i32_1 = arith.constant 0 : i32
    return %c0_i32, %c0_i32_0 : i32, i32
  }
  func.func @transform_3(%arg0: i32, %arg1: i32) -> (i32, i32, i32) {
    %c0_i32 = arith.constant 0 : i32
    %c0_i32_0 = arith.constant 0 : i32
    return %arg0, %arg1, %c0_i32 : i32, i32, i32
  }
}

</mosaic_0001>

<bundles_post_ra>
// kernel: tile.18
= control target key start
LH: loop header
LB: loop body
LE: loop exit
PB: predicated region body
PF: predicated region fallthrough
CT: control target
= control target key end

     0   :  { %s28_s0 = inlined_call_operand.vmem [shape: f32[8], index: 0, kind: input, shape index: {}]   ;;  %s29_s1 = inlined_call_operand.vmem [shape: f32[16,8], index: 1, kind: output, shape index: {}]  }
   0x1   :  { %v4_v0 = vld [vmem:[%s28_s0] ss:$0 sm:$0xff] }
   0x2   :  { %5 = vst [vmem:[%s29_s1] sm:$0xff] %v4_v0  ;;  %8 = vst [vmem:[%s29_s1 + $0x8] sm:$0xff] %v4_v0 }

// kernel: tile.19
= control target key start
LH: loop header
LB: loop body
LE: loop exit
PB: predicated region body
PF: predicated region fallthrough
CT: control target
= control target key end

     0   :  { %s133_s10 = smov 120   ;;  %s134_s11 = smov 104   ;;  %vm3_vm0 = vcmask 64512   ;;  %vm9_vm1 = vcmask 1048512   ;;  %vm15_vm2 = vcmask 982912   ;;  %vm21_vm3 = vcmask 917312   ;;  %s209_s0 = inlined_call_operand.vmem [shape: f32[16,8], index: 0, kind: input, shape index: {}]   ;;  %s210_s1 = inlined_call_operand.vmem [shape: f32[1,128], index: 1, kind: output, shape index: {}]  }
   0x1   :  { %v103_v0 = vld [vmem:[%s209_s0 + $0xf] sm:$0x1]   ;;  %v105_v1 = vld [vmem:[%s209_s0 + $0xd] sm:$0x1]   ;;  %v104_v2 = vld [vmem:[%s209_s0 + $0xe] sm:$0x1]  }
   0x2   :  { %7 = vrot.lane.b32.xlu0 %v103_v0, %s133_s10  ;;  %19 = vrot.lane.b32.xlu1 %v105_v1, %s134_s11  ;;  %v106_v3 = vld [vmem:[%s209_s0 + $0xc] sm:$0x1]   ;;  %s135_s16 = smov 112   ;;  %s136_s17 = smov 96   ;;  %v107_v4 = vld [vmem:[%s209_s0 + $0xb] sm:$0x1]  }
   0x3   :  { %v108_v5 = vld [vmem:[%s209_s0 + $0xa] sm:$0x1]   ;;  %v2_v6 = vld [vmem:[%s209_s0] sm:$0x1]   ;;  %s137_s24 = smov 88   ;;  %s138_s25 = smov 80  }
   0x4   :  { %4 = vst.msk [vmem:[#allocation0] sm:$0x1] %vm3_vm0, %v2_v6   ;;  %v109_v7 = vld [vmem:[%s209_s0 + $0x9] sm:$0x1]   ;;  %v110_v8 = vld [vmem:[%s209_s0 + $0x8] sm:$0x1]  }
   0x5   :  { %s139_s30 = smov 72   ;;  %s140_s2 = smov 64   ;;  %v111_v9 = vld [vmem:[%s209_s0 + $0x7] sm:$0x1]   ;;  %v112_v10 = vld [vmem:[%s209_s0 + $0x6] sm:$0x1]  }
   0x6   :  { %13 = vrot.lane.b32.xlu0 %v104_v2, %s135_s16  ;;  %25 = vrot.lane.b32.xlu1 %v106_v3, %s136_s17  ;;  %s141_s7 = smov 56   ;;  %s142_s8 = smov 48   ;;  %v113_v11 = vld [vmem:[%s209_s0 + $0x5] sm:$0x1]   ;;  %v114_v12 = vld [vmem:[%s209_s0 + $0x4] sm:$0x1]  }
   0x7   :  { %s143_s13 = smov 40   ;;  %s144_s14 = smov 32   ;;  %v115_v13 = vld [vmem:[%s209_s0 + $0x3] sm:$0x1]   ;;  %v116_v14 = vld [vmem:[%s209_s0 + $0x2] sm:$0x1]  }
   0x8   :  { %s145_s19 = smov 24   ;;  %s146_s20 = smov 16   ;;  %v117_v15 = vld [vmem:[%s209_s0 + $0x1] sm:$0x1]   ;;  %vm27_vm4 = vcmask 851712   ;;  %vm33_vm5 = vcmask 786112  }
   0x9   :  { %s147_s0 = smov 8   ;;  %vm39_vm6 = vcmask 720512   ;;  %vm45_vm7 = vcmask 654912   ;;  %vm51_vm8 = vcmask 589312   ;;  %vm57_vm9 = vcmask 523712  }
   0xa   :  { %31 = vrot.lane.b32.xlu0 %v107_v4, %s137_s24  ;;  %37 = vrot.lane.b32.xlu1 %v108_v5, %s138_s25  ;;  %vm63_vm10 = vcmask 458112   ;;  %vm69_vm11 = vcmask 392512   ;;  %vm75_vm12 = vcmask 326912   ;;  %vm81_vm13 = vcmask 261312  }
   0xb   :  { %vm87_vm14 = vcmask 195712   ;;  %vm93_vm15 = vcmask 130112  }
   0xe   :  { %43 = vrot.lane.b32.xlu0 %v109_v7, %s139_s30  ;;  %49 = vrot.lane.b32.xlu1 %v110_v8, %s140_s2 }
  0x12   :  { %55 = vrot.lane.b32.xlu0 %v111_v9, %s141_s7  ;;  %61 = vrot.lane.b32.xlu1 %v112_v10, %s142_s8 }
  0x16   :  { %67 = vrot.lane.b32.xlu0 %v113_v11, %s143_s13  ;;  %73 = vrot.lane.b32.xlu1 %v114_v12, %s144_s14 }
  0x1a   :  { %79 = vrot.lane.b32.xlu0 %v115_v13, %s145_s19  ;;  %85 = vrot.lane.b32.xlu1 %v116_v14, %s146_s20 }
  0x1e   :  { %91 = vrot.lane.b32.xlu0 %v117_v15, %s147_s0 }
  0x74   :  { %v8_v16 = vpop.permute.xlu0 %7   ;;  %v20_v17 = vpop.permute.xlu1 %19  }
  0x75   :  { %10 = vst.msk [vmem:[#allocation0] sm:$0x1] %vm9_vm1, %v8_v16  }
  0x78   :  { %v14_v18 = vpop.permute.xlu0 %13   ;;  %v26_v19 = vpop.permute.xlu1 %25  }
  0x79   :  { %16 = vst.msk [vmem:[#allocation0] sm:$0x1] %vm15_vm2, %v14_v18  }
  0x7a   :  { %22 = vst.msk [vmem:[#allocation0] sm:$0x1] %vm21_vm3, %v20_v17  }
  0x7b   :  { %28 = vst.msk [vmem:[#allocation0] sm:$0x1] %vm27_vm4, %v26_v19  }
  0x7c   :  { %v32_v20 = vpop.permute.xlu0 %31   ;;  %v38_v21 = vpop.permute.xlu1 %37  }
  0x7d   :  { %34 = vst.msk [vmem:[#allocation0] sm:$0x1] %vm33_vm5, %v32_v20  }
  0x7e   :  { %40 = vst.msk [vmem:[#allocation0] sm:$0x1] %vm39_vm6, %v38_v21  }
  0x80   :  { %v44_v22 = vpop.permute.xlu0 %43   ;;  %v50_v23 = vpop.permute.xlu1 %49  }
  0x81   :  { %46 = vst.msk [vmem:[#allocation0] sm:$0x1] %vm45_vm7, %v44_v22  }
  0x82   :  { %52 = vst.msk [vmem:[#allocation0] sm:$0x1] %vm51_vm8, %v50_v23  }
  0x84   :  { %v56_v24 = vpop.permute.xlu0 %55   ;;  %v62_v25 = vpop.permute.xlu1 %61  }
  0x85   :  { %58 = vst.msk [vmem:[#allocation0] sm:$0x1] %vm57_vm9, %v56_v24  }
  0x86   :  { %64 = vst.msk [vmem:[#allocation0] sm:$0x1] %vm63_vm10, %v62_v25  }
  0x88   :  { %v68_v26 = vpop.permute.xlu0 %67   ;;  %v74_v27 = vpop.permute.xlu1 %73  }
  0x89   :  { %70 = vst.msk [vmem:[#allocation0] sm:$0x1] %vm69_vm11, %v68_v26  }
  0x8a   :  { %76 = vst.msk [vmem:[#allocation0] sm:$0x1] %vm75_vm12, %v74_v27  }
  0x8c   :  { %v80_v28 = vpop.permute.xlu0 %79   ;;  %v86_v29 = vpop.permute.xlu1 %85  }
  0x8d   :  { %82 = vst.msk [vmem:[#allocation0] sm:$0x1] %vm81_vm13, %v80_v28  }
  0x8e   :  { %88 = vst.msk [vmem:[#allocation0] sm:$0x1] %vm87_vm14, %v86_v29  }
  0x90   :  { %v92_v30 = vpop.permute.xlu0 %91  }
  0x91   :  { %94 = vst.msk [vmem:[#allocation0] sm:$0x1] %vm93_vm15, %v92_v30  }
  0x98   :  { %v99_v31 = vld [vmem:[#allocation0] sm:$0x1] }
  0x99   :  { %102 = vst [vmem:[%s210_s1] sm:$0x1] %v99_v31 }

// kernel: conv2d_leakyrelu_bn.3
= control target key start
LH: loop header
LB: loop body
LE: loop exit
PB: predicated region body
PF: predicated region fallthrough
CT: control target
= control target key end

     0   :  { %s419_s12 = smov 0   ;;  %s421_s13 = smov 0   ;;  %s470_s0 = inlined_call_operand.vmem [shape: f32[2,16,128], index: 0, kind: input, shape index: {}]   ;;  %s471_s1 = inlined_call_operand.vmem [shape: f32[1,128], index: 1, kind: input, shape index: {}]   ;;  %s472_s2 = inlined_call_operand.vmem [shape: f32[1,128], index: 2, kind: input, shape index: {}]   ;;  %s473_s3 = inlined_call_operand.vmem [shape: f32[2,16,128], index: 3, kind: output, shape index: {}]  }
   0x1   :  { %s423_s14 = smov 0   ;;  %s425_s15 = smov 0  }
   0x2   :  { %s427_s16 = smov 0  }
   0x3 LB: > { %s22_s17 = sadd.s32 1, %s389_s14  ;;  %s25_s18 = sadd.s32 1, %s393_s15  ;;  %s397_s16 = sphi %s427_s16, %s13_s16   ;;  %s393_s15 = sphi %s425_s15, %s477_s15   ;;  %s389_s14 = sphi %s423_s14, %s476_s14   ;;  %s385_s13 = sphi %s421_s13, %s475_s13   ;;  %s381_s12 = sphi %s419_s12, %s474_s12  }
   0x4   : > { %p23_p0 = scmp.ge.s32.totalorder %s22_s17, 2  ;;  %p310_p1 = scmp.ge.s32.totalorder %s397_s16, 1 }
   0x5   : > { %p156_p2 = scmp.lt.s32.totalorder %s397_s16, 5 }
   0x6   : > { %s479_s17 = smov (%p23_p0, %s22_s17), 0  ;;  %s481_s18 = smov (!%p23_p0, %s25_s18), %s393_s15 }
   0x7   : > { %p157_p3 = pnand %p310_p1, %p156_p2  ;;  %p27_p4 = scmp.ge.s32.totalorder %s481_s18, 2 }
   0x8   : > { %p186_p5 = scmp.lt.s32.totalorder (!%p157_p3), %s385_s13, 1  ;;  %p188_p6 = scmp.lt.s32.totalorder (!%p157_p3), %s381_s12, 1 }
   0x9   : > { %s483_s18 = smov (%p27_p4, %s481_s18), 0  ;;  %160 = sbr.rel (%p157_p3) target bundleno = 25 (0x19), region = 32 }
   0xe   : > { %s485_s13 = smov (!%p186_p5, %s385_s13), 1  ;;  %s487_s12 = smov (!%p188_p6, %s381_s12), 1  ;;  %v315_v0 = vld [vmem:[%s471_s1] ss:$0 sm:$0xff] }
   0xf   : > { %s311_s19 = sshll.u32 %s485_s13, 1  ;;  %v316_v2 = vld [vmem:[%s472_s2] ss:$0 sm:$0xff] }
  0x10   : > { %s191_s20 = sadd.s32 %s311_s19, %s487_s12 }
  0x11   : > { %s312_s21 = sshll.u32 %s191_s20, 3 }
  0x12   : > { %s193_s26 = scalar_lea.vmem %s470_s0, %s312_s21  ;;  %s201_s4 = scalar_lea.vmem %s473_s3, %s312_s21 }
  0x13   : > { %v202_v1 = vld [vmem:[%s193_s26] sm:$0xff] }
  0x14   : > { %v210_v3 = vmul.f32 %v315_v0, %v202_v1 }
  0x16   : > { %v218_v4 = vadd.f32 %v316_v2, %v210_v3 }
  0x18   : > { %219 = vst [vmem:[%s201_s4] sm:$0xff] %v218_v4 }
  0x19 PF: > { %s13_s16 = sadd.s32 1, %s397_s16   ;;  %s474_s12 = smov %s389_s14 }
  0x1a   : > { %p10_p7 = scmp.ge.s32.totalorder %s13_s16, 6   ;;  %s475_s13 = smov %s393_s15 }
  0x1b   : > { %s476_s14 = smov %s479_s17  ;;  %s477_s15 = smov %s483_s18 }
  0x1c   :  { %12 = sbr.rel (!%p10_p7) target bundleno = 3 (0x3), region = 62 }

// kernel: conv2d_leakyrelu_bn.2
= control target key start
LH: loop header
LB: loop body
LE: loop exit
PB: predicated region body
PF: predicated region fallthrough
CT: control target
= control target key end

     0   :  { %s895_s15 = smov 0   ;;  %s897_s16 = smov 0   ;;  %s1086_s0 = inlined_call_operand.vmem [shape: f32[2,18,72], index: 0, kind: input, shape index: {}]   ;;  %s1087_s1 = inlined_call_operand.vmem [shape: f32[3,72,128], index: 1, kind: input, shape index: {}]   ;;  %s1088_s2 = inlined_call_operand.vmem [shape: f32[1,128], index: 2, kind: input, shape index: {}]   ;;  %s1089_s3 = inlined_call_operand.vmem [shape: f32[2,16,128], index: 3, kind: output, shape index: {0}]   ;;  %s1090_s4 = inlined_call_operand.vmem [shape: f32[4,2,128], index: 4, kind: output, shape index: {1}]  }
   0x1   :  { %s899_s17 = smov 0   ;;  %s901_s18 = smov 0  }
   0x2   :  { %s903_s19 = smov 0  }
   0x3 LB: > { %s24_s20 = sadd.s32 1, %s858_s17  ;;  %s27_s21 = sadd.s32 1, %s862_s18  ;;  %s866_s19 = sphi %s903_s19, %s15_s19   ;;  %s862_s18 = sphi %s901_s18, %s1094_s18   ;;  %s858_s17 = sphi %s899_s17, %s1093_s17   ;;  %s854_s16 = sphi %s897_s16, %s1092_s16   ;;  %s850_s15 = sphi %s895_s15, %s1091_s15  }
   0x4   : > { %p25_p0 = scmp.ge.s32.totalorder %s24_s20, 2  ;;  %p657_p1 = scmp.ge.s32.totalorder %s866_s19, 1 }
   0x5   : > { %p183_p2 = scmp.lt.s32.totalorder %s866_s19, 5 }
   0x6   : > { %s1096_s20 = smov (%p25_p0, %s24_s20), 0  ;;  %s1098_s21 = smov (!%p25_p0, %s27_s21), %s862_s18 }
   0x7   : > { %p184_p3 = pnand %p657_p1, %p183_p2  ;;  %p29_p4 = scmp.ge.s32.totalorder %s1098_s21, 2 }
   0x8   : > { %p218_p5 = scmp.lt.s32.totalorder (!%p184_p3), %s854_s16, 1  ;;  %s663_s7 = sshll.u32 (!%p184_p3), %s850_s15, 3 }
   0x9   : > { %s1100_s21 = smov (%p29_p4, %s1098_s21), 0  ;;  %187 = sbr.rel (%p184_p3) target bundleno = 269 (0x10d), region = 32 }
   0xa   : > { %p225_p6 = scmp.lt.s32.totalorder (!%p184_p3), %s850_s15, 1  ;;  %s661_s9 = sshll.u32 (!%p184_p3), %s854_s16, 1 }
   0xe   : > { %v674_v0 = vld [vmem:[%s1087_s1 + $0x88] sm:$0xff]  ;;  %v250_v1 = vld [vmem:[%s1087_s1 + $0x40] sm:$0xff]  ;;  %v868_v2 = vmov 0.0   ;;  %v249_v4 = vld [vmem:[%s1087_s1 + $0x38] sm:$0xff]  ;;  %s945_s30 = scalar_select %p218_p5, %s854_s16, 1  ;;  %vm264_vm0 = vcmask 588800  }
   0xf   : > { %722 = vmatprep.subr.mxu0 %v868_v2  ;;  %743 = vmatprep.subr.mxu1 %v868_v2  ;;  %v673_v3 = vld [vmem:[%s1087_s1 + $0x80] sm:$0xff]  ;;  %v672_v5 = vld [vmem:[%s1087_s1 + $0x78] sm:$0xff]  ;;  %v248_v6 = vld [vmem:[%s1087_s1 + $0x30] sm:$0xff]  ;;  %vm869_vm1 = vmmov 0   ;;  %s226_s29 = scalar_select %p225_p6, %s850_s15, 1  ;;  %vm522_vm2 = vcmask 1040384  }
  0x10   : > { %723 = vmatpush3.msra.mxu0 %v674_v0  ;;  %744 = vmatpush3.msra.mxu1 %v250_v1  ;;  %v671_v7 = vld [vmem:[%s1087_s1 + $0x70] sm:$0xff]  ;;  %v247_v8 = vld [vmem:[%s1087_s1 + $0x28] sm:$0xff]  ;;  %s785_s13 = smul.u32 24, %s945_s30  ;;  %v246_v10 = vld [vmem:[%s1087_s1 + $0x20] sm:$0xff]  ;;  %s659_s5 = sshll.u32 %s945_s30, 1 }
  0x11   : > { %724 = vmatprep.subr.mxu0 %v868_v2  ;;  %745 = vmatprep.subr.mxu1 %v868_v2  ;;  %v670_v9 = vld [vmem:[%s1087_s1 + $0x68] sm:$0xff]  ;;  %v669_v11 = vld [vmem:[%s1087_s1 + $0x60] sm:$0xff]  ;;  %v245_v12 = vld [vmem:[%s1087_s1 + $0x18] sm:$0xff] }
  0x12   : > { %725 = vmatpush3.msra.mxu0 %v673_v3  ;;  %746 = vmatpush3.msra.mxu1 %v249_v4  ;;  %s222_s6 = scalar_lea.vmem %s1086_s0, %s785_s13  ;;  %v668_v13 = vld [vmem:[%s1087_s1 + $0x58] sm:$0xff]  ;;  %v244_v14 = vld [vmem:[%s1087_s1 + $0x10] sm:$0xff]  ;;  %v243_v16 = vld [vmem:[%s1087_s1 + $0x8] sm:$0xff]  ;;  %s232_s13 = sadd.s32 %s850_s15, %s661_s9 }
  0x13   : > { %726 = vmatprep.subr.mxu0 %v868_v2  ;;  %747 = vmatprep.subr.mxu1 %v868_v2  ;;  %v667_v15 = vld [vmem:[%s1087_s1 + $0x50] sm:$0xff]  ;;  %s1000_s23 = scalar_lea.vmem %s222_s6, %s663_s7  ;;  %v666_v17 = vld [vmem:[%s1087_s1 + $0x48] sm:$0xff]  ;;  %v242_v19 = vld [vmem:[%s1087_s1] sm:$0xff]  ;;  %s228_s6 = sadd.s32 %s659_s5, %s226_s29 }
  0x14   : > { %727 = vmatpush3.msra.mxu0 %v672_v5  ;;  %748 = vmatpush3.msra.mxu1 %v248_v6  ;;  %v665_v18 = vld [vmem:[%s1000_s23 + $0x1] sm:$0xff]  ;;  %v687_v21 = vld [vmem:[%s1087_s1 + $0xd0] sm:$0xff]  ;;  %v684_v24 = vld [vmem:[%s1087_s1 + $0xb8] sm:$0xff]  ;;  %p233_p7 = scmp.lt.s32.totalorder %s232_s13, 3 }
  0x15   : > { %728 = vmatprep.subr.mxu0 %v868_v2  ;;  %749 = vmatprep.subr.mxu1 %v868_v2  ;;  %v241_v20 = vld [vmem:[%s1000_s23] sm:$0xff]  ;;  %v686_v22 = vld [vmem:[%s1087_s1 + $0xc8] sm:$0xff]  ;;  %v683_v25 = vld [vmem:[%s1087_s1 + $0xb0] sm:$0xff] }
  0x16   : > { %729 = vmatpush3.msra.mxu0 %v671_v7  ;;  %750 = vmatpush3.msra.mxu1 %v247_v8  ;;  %v685_v23 = vld [vmem:[%s1087_s1 + $0xc0] sm:$0xff]  ;;  %v682_v26 = vld [vmem:[%s1087_s1 + $0xa8] sm:$0xff]  ;;  %v680_v28 = vld [vmem:[%s1087_s1 + $0x98] sm:$0xff]  ;;  %s1102_s13 = smov (!%p233_p7, %s232_s13), 3 }
  0x17   : > { %730 = vmatprep.subr.mxu0 %v868_v2  ;;  %751 = vmatprep.subr.mxu1 %v868_v2  ;;  %v681_v27 = vld [vmem:[%s1087_s1 + $0xa0] sm:$0xff]  ;;  %v679_v29 = vld [vmem:[%s1087_s1 + $0x90] sm:$0xff]  ;;  %s662_s16 = sshll.u32 %s1102_s13, 1 }
  0x18   : > { %731 = vmatpush3.msra.mxu0 %v670_v9  ;;  %752 = vmatpush3.msra.mxu1 %v246_v10  ;;  %v678_v30 = vld [vmem:[%s1000_s23 + $0x2] sm:$0xff]  ;;  %v689_v37 = vld [vmem:[%s1088_s2] ss:$0 sm:$0xff]  ;;  %s660_s23 = sshll.u32 %s228_s6, 3  ;;  %s236_s15 = scalar_lea.vmem %s1090_s4, %s662_s16 }
  0x19   : > { %732 = vmatprep.subr.mxu0 %v868_v2  ;;  %753 = vmatprep.subr.mxu1 %v868_v2  ;;  %s230_s12 = scalar_lea.vmem %s1089_s3, %s660_s23 }
  0x1a   : > { %733 = vmatpush3.msra.mxu0 %v669_v11  ;;  %754 = vmatpush3.msra.mxu1 %v245_v12 }
  0x1b   : > { %734 = vmatprep.subr.mxu0 %v868_v2  ;;  %755 = vmatprep.subr.mxu1 %v868_v2 }
  0x1c   : > { %735 = vmatpush3.msra.mxu0 %v668_v13  ;;  %756 = vmatpush3.msra.mxu1 %v244_v14 }
  0x1d   : > { %736 = vmatprep.subr.mxu0 %v868_v2  ;;  %757 = vmatprep.subr.mxu1 %v868_v2 }
  0x1e   : > { %737 = vmatpush3.msra.mxu0 %v667_v15  ;;  %758 = vmatpush3.msra.mxu1 %v243_v16 }
  0x1f   : > { %738 = vmatprep.subr.mxu0 %v868_v2  ;;  %740 = vmatprep.mubr.msk.f32.mxu0 %vm869_vm1, %v868_v2 }
  0x20   : > { %739 = vmatpush3.msra.mxu0 %v666_v17  ;;  %759 = vmatprep.subr.mxu1 %v868_v2 }
  0x21   : > { %741 = vmatmul.mubr.msk.f32.vlgmr.msra.gmra.mxu0 %vm264_vm0, %v665_v18  ;;  %760 = vmatpush3.msra.mxu1 %v242_v19 }
  0x22   : > { %761 = vmatprep.mubr.msk.f32.mxu1 %vm869_vm1, %v868_v2  ;;  %764 = vmatprep.subr.mxu0 %v868_v2 }
  0x23   : > { %762 = vmatmul.mubr.msk.f32.vlgmr.msra.gmra.mxu1 %vm264_vm0, %v241_v20  ;;  %765 = vmatpush3.msra.mxu0 %v687_v21 }
  0x24   : > { %766 = vmatprep.subr.mxu0 %v868_v2  ;;  %782 = vmatprep.mubr.msk.f32.mxu0 %vm869_vm1, %v868_v2 }
  0x25   : > { %767 = vmatpush3.msra.mxu0 %v686_v22 }
  0x26   : > { %768 = vmatprep.subr.mxu0 %v868_v2 }
  0x27   : > { %769 = vmatpush3.msra.mxu0 %v685_v23 }
  0x28   : > { %770 = vmatprep.subr.mxu0 %v868_v2 }
  0x29   : > { %771 = vmatpush3.msra.mxu0 %v684_v24 }
  0x2a   : > { %772 = vmatprep.subr.mxu0 %v868_v2 }
  0x2b   : > { %773 = vmatpush3.msra.mxu0 %v683_v25 }
  0x2c   : > { %774 = vmatprep.subr.mxu0 %v868_v2 }
  0x2d   : > { %775 = vmatpush3.msra.mxu0 %v682_v26 }
  0x2e   : > { %776 = vmatprep.subr.mxu0 %v868_v2 }
  0x2f   : > { %777 = vmatpush3.msra.mxu0 %v681_v27 }
  0x30   : > { %778 = vmatprep.subr.mxu0 %v868_v2 }
  0x31   : > { %779 = vmatpush3.msra.mxu0 %v680_v28 }
  0x32   : > { %780 = vmatprep.subr.mxu0 %v868_v2 }
  0x33   : > { %781 = vmatpush3.msra.mxu0 %v679_v29 }
  0x34   : > { %783 = vmatmul.mubr.msk.f32.vlgmr.msra.gmra.mxu0 %vm264_vm0, %v678_v30 }
  0xe1   : > { %v334_v31 = vpop.f32.mrf.mxu0 }
  0xe3   : > { %v407_v32 = vpop.f32.mrf.mxu1  ;;  %v742_v33 = vpop.f32.mrf.mxu0 }
  0xe4   : > { %v408_v35 = vadd.f32 %v407_v32, %v334_v31 }
  0xe5   : > { %v763_v34 = vpop.f32.mrf.mxu1 }
  0xf4   : > { %v493_v36 = vpop.f32.mrf.mxu0 }
  0xf5   : > { %v497_v38 = vadd.f32 %v493_v36, %v408_v35 }
  0xf6   : > { %v784_v39 = vpop.f32.mrf.mxu0 }
  0xf7   : > { %v505_v40 = vadd.f32 %v689_v37, %v497_v38 }
  0xf9   : > { %v506_v41 = vmul.f32 0.1, %v505_v40 }
  0xfb   : > { %v507_v42 = vmax.f32 %v505_v40, %v506_v41 }
  0xfd   : > { %508 = vst [vmem:[%s230_s12] sm:$0xff] %v507_v42  ;;  %v509_v43 = vrot.slane %v507_v42, 4  ;;  %v515_v44 = vmul.f32 %v507_v42, %v507_v42 }
  0xff   : > { %v510_v45 = vadd.f32 %v509_v43, %v507_v42  ;;  %v516_v46 = vrot.slane %v515_v44, 4 }
 0x101   : > { %v511_v47 = vrot.slane %v510_v45, 2  ;;  %v517_v48 = vadd.f32 %v516_v46, %v515_v44 }
 0x103   : > { %v512_v49 = vadd.f32 %v511_v47, %v510_v45  ;;  %v518_v50 = vrot.slane %v517_v48, 2 }
 0x105   : > { %v513_v51 = vrot.slane %v512_v49, 1  ;;  %v519_v52 = vadd.f32 %v518_v50, %v517_v48 }
 0x107   : > { %v520_v53 = vrot.slane %v519_v52, 1  ;;  %v514_v54 = vadd.f32 %v513_v51, %v512_v49 }
 0x109   : > { %v521_v55 = vadd.f32 %v520_v53, %v519_v52 }
 0x10b   : > { %v523_v56 = vsel %vm522_vm2, %v514_v54, %v521_v55 }
 0x10c   : > { %524 = vst [vmem:[%s236_s15] sm:$0x3] %v523_v56 }
 0x10d PF: > { %s15_s19 = sadd.s32 1, %s866_s19   ;;  %s1091_s15 = smov %s858_s17 }
 0x10e   : > { %p12_p8 = scmp.ge.s32.totalorder %s15_s19, 6   ;;  %s1092_s16 = smov %s862_s18 }
 0x10f   : > { %s1093_s17 = smov %s1096_s20  ;;  %s1094_s18 = smov %s1100_s21 }
 0x110   :  { %14 = sbr.rel (!%p12_p8) target bundleno = 3 (0x3), region = 79 }

</bundles_post_ra>
